<compile_context>
chip_gen: v6e
topology: v6e:2x2x1
jax: 0.10.0
libtpu: 0.0.40
codegen_flags: <defaults>
</compile_context>

<pallas_src>
import jax
import jax.numpy as jnp
from jax import lax
from jax.experimental import pallas as pl
from jax.experimental.pallas import tpu as pltpu

EPS = 1e-5  # nn.LayerNorm default


def prenorm_kernel(x_ref, gamma_ref, beta_ref, w_ref, b_ref, o_ref):
    # ---- LayerNorm over the feature (lane) axis, f32 math, single pass -----
    x32 = x_ref[...].astype(jnp.float32)                       # (TM, D)
    inv_d = jnp.float32(1.0 / x32.shape[-1])
    s1 = jnp.sum(x32, axis=-1, keepdims=True)                  # (TM, 1)
    s2 = jnp.sum(x32 * x32, axis=-1, keepdims=True)            # (TM, 1)
    mean = s1 * inv_d
    var = jnp.maximum(s2 * inv_d - mean * mean, 0.0)
    inv_std = lax.rsqrt(var + EPS)
    normed = ((x32 - mean) * inv_std * gamma_ref[...].astype(jnp.float32)
              + beta_ref[...].astype(jnp.float32))

    # ---- sub-layer Linear(D, D): bf16 operands on the MXU, f32 accumulate --
    y = jnp.dot(normed.astype(jnp.bfloat16), w_ref[...],
                preferred_element_type=jnp.float32)
    y = y + b_ref[...].astype(jnp.float32)

    # ---- residual add: re-read the bf16 VMEM tile (cheap vld) so the f32
    #      copy of x need not stay live across the MXU call.
    o_ref[...] = (x_ref[...].astype(jnp.float32) + y).astype(o_ref.dtype)


def _pick_tm(n, d, itemsize, *, align=16, target_bytes=2 << 20, min_grid=2):
    """Largest row tile that divides n, is a multiple of `align`, keeps the
    x block under `target_bytes`, and leaves >= min_grid grid steps.
    Returns None if n is not a multiple of `align` (caller pads)."""
    if n % align != 0:
        return None
    best = None
    tm = align
    while tm <= n:
        if n % tm == 0 and n // tm >= min_grid and tm * d * itemsize <= target_bytes:
            best = tm
        tm += align
    if best is not None:
        return best
    # Could not satisfy the byte target with >= min_grid steps: take the
    # smallest aligned divisor that still gives min_grid steps, else one step.
    tm = align
    while tm <= n:
        if n % tm == 0 and n // tm >= min_grid:
            return tm
        tm += align
    return n


def prenorm(x, gamma, beta, w, b, *, io_dtype=jnp.bfloat16,
            target_block_bytes=2 << 20):
    """x: (B, S, D). Returns x + Linear(LayerNorm(x)) fused in one kernel.

    Activation I/O runs in `io_dtype` (bf16 by default: the kernel is
    HBM-bandwidth-bound at these shapes, so halving activation bytes is the
    dominant lever). LN statistics and the matmul accumulator are f32.
    The returned array has dtype `io_dtype`.
    """
    B, S, D = x.shape
    N = B * S
    x2 = x.reshape(N, D)
    if x2.dtype != io_dtype:
        x2 = x2.astype(io_dtype)            # cast once, outside the kernel
    io_itemsize = jnp.dtype(io_dtype).itemsize

    # ---- row tile: divisor of N, multiple of 16, ~target_block_bytes/block,
    #      >= 2 grid steps so "parallel" shards across 2 TCs on v7x ----------
    tm = _pick_tm(N, D, io_itemsize, align=16,
                  target_bytes=target_block_bytes, min_grid=2)
    if tm is None:
        # Ragged N fallback: pad to the tile (zero rows are LayerNorm-safe,
        # sliced off below). Avoided in the common case per perf review.
        tm = max(16, min((target_block_bytes // (D * io_itemsize)) // 16 * 16,
                         pl.cdiv(N, 16) * 16))
        n_pad = pl.cdiv(N, tm) * tm
        x2 = jnp.pad(x2, ((0, n_pad - N), (0, 0)))
    else:
        n_pad = N
    grid = (n_pad // tm,)

    w_bf16 = w.astype(jnp.bfloat16)         # cast once, outside the kernel

    # ---- explicit VMEM budget (v7x: 64 MiB physical / 32 MiB scoped default;
    #      v5e: 16 MiB scoped default) --------------------------------------
    block_bytes = tm * D * io_itemsize
    vmem_need = (4 * block_bytes            # x + out, double-buffered
                 + 2 * D * D * 2            # resident bf16 W (2 bufs, conservative)
                 + 2 * 3 * D * 4)           # gamma, beta, bias
    vmem_limit = int(min(max(2 * vmem_need, 16 << 20), 48 << 20))

    cost = pl.CostEstimate(
        flops=2 * n_pad * D * D + 10 * n_pad * D,
        transcendentals=n_pad,
        bytes_accessed=2 * n_pad * D * io_itemsize + 2 * D * D + 3 * D * 4,
    )

    out2 = pl.pallas_call(
        prenorm_kernel,
        out_shape=jax.ShapeDtypeStruct((n_pad, D), io_dtype),
        grid=grid,
        in_specs=[
            pl.BlockSpec((tm, D), lambda i: (i, 0)),   # x      (row-tiled, bf16)
            pl.BlockSpec((1, D), lambda i: (0, 0)),    # gamma  (resident)
            pl.BlockSpec((1, D), lambda i: (0, 0)),    # beta   (resident)
            pl.BlockSpec((D, D), lambda i: (0, 0)),    # W bf16 (resident)
            pl.BlockSpec((1, D), lambda i: (0, 0)),    # bias   (resident)
        ],
        out_specs=pl.BlockSpec((tm, D), lambda i: (i, 0)),
        compiler_params=pltpu.CompilerParams(
            dimension_semantics=("parallel",),         # rows independent -> megacore
            vmem_limit_bytes=vmem_limit),
        cost_estimate=cost,
    )(x2, gamma, beta, w_bf16, b)

    if n_pad != N:
        out2 = out2[:N]
    return out2.reshape(B, S, D)

    # TODO(synk): D >= ~4096 would need a column-tiled W / output grid axis to
    # stay within v7x's scoped VMEM; at D <= 1024 resident W is correct.


def prenorm_ref(x, gamma, beta, w, b):
    """Pure-JAX f32 reference mirroring the PyTorch module (LN + Linear + res)."""
    mean = jnp.mean(x, axis=-1, keepdims=True)
    var = jnp.mean((x - mean) ** 2, axis=-1, keepdims=True)
    normed = (x - mean) * lax.rsqrt(var + EPS) * gamma[0] + beta[0]
    return x + normed @ w + b[0]


if __name__ == "__main__":
    # Lane-dense feature dim (multiple of 128); N = 256 rows -> tile picker
    # chooses tm=128 (divisor of N, multiple of 16) -> grid of 2 steps,
    # exercising the double-buffered pipeline with no pad/slice round-trip.
    B, S, D = 2, 128, 128

    key = jax.random.PRNGKey(0)
    kx, kw, kb = jax.random.split(key, 3)

    x = jax.random.normal(kx, (B, S, D), dtype=jnp.float32)

    # nn.LayerNorm(dim) default init: weight = ones, bias = zeros.
    gamma = jnp.ones((1, D), dtype=jnp.float32)
    beta = jnp.zeros((1, D), dtype=jnp.float32)

    # Deterministic init for the sub-layer Linear(dim, dim).
    w = jax.random.normal(kw, (D, D), dtype=jnp.float32) * (1.0 / jnp.sqrt(D))
    b = jax.random.normal(kb, (1, D), dtype=jnp.float32) * 0.02

    out = prenorm(x, gamma, beta, w, b)          # bf16 I/O path
    jax.block_until_ready(out)

    # Reference computed in f32 from the same bf16-rounded activations the
    # kernel consumed; compare at bf16 tolerance.
    xb = x.astype(jnp.bfloat16).astype(jnp.float32)
    ref = prenorm_ref(xb, gamma, beta, w, b)
    assert out.shape == (B, S, D)
    assert out.dtype == jnp.bfloat16
    err = float(jnp.max(jnp.abs(out.astype(jnp.float32) - ref)))
    assert jnp.allclose(out.astype(jnp.float32), ref, atol=1e-1, rtol=5e-2), err

    print("KERNEL_OK")
</pallas_src>

<mosaic_0001>
module attributes {stable_mosaic.version = 11 : i64} {
  func.func @prenorm_kernel(%arg0: i32, %arg1: memref<128x128xbf16, #tpu.memory_space<vmem>>, %arg2: memref<1x128xf32, #tpu.memory_space<vmem>>, %arg3: memref<1x128xf32, #tpu.memory_space<vmem>>, %arg4: memref<128x128xbf16, #tpu.memory_space<vmem>>, %arg5: memref<1x128xf32, #tpu.memory_space<vmem>>, %arg6: memref<128x128xbf16, #tpu.memory_space<vmem>>) attributes {dimension_semantics = [#tpu.dimension_semantics<parallel>], iteration_bounds = array<i64: 2>, scalar_prefetch = 0 : i64, scratch_operands = 0 : i64, tpu.core_type = #tpu.core_type<tc>, window_params = [{transform_indices = @transform_0, window_bounds = array<i64: 128, 128>}, {pipeline_mode = #tpu.pipeline_mode<synchronous>, transform_indices = @transform_1, window_bounds = array<i64: 1, 128>}, {pipeline_mode = #tpu.pipeline_mode<synchronous>, transform_indices = @transform_2, window_bounds = array<i64: 1, 128>}, {pipeline_mode = #tpu.pipeline_mode<synchronous>, transform_indices = @transform_3, window_bounds = array<i64: 128, 128>}, {pipeline_mode = #tpu.pipeline_mode<synchronous>, transform_indices = @transform_4, window_bounds = array<i64: 1, 128>}, {transform_indices = @transform_5, window_bounds = array<i64: 128, 128>}]} {
    %c0 = arith.constant 0 : index
    %c0_0 = arith.constant 0 : index
    %0 = vector.load %arg1[%c0, %c0_0] : memref<128x128xbf16, #tpu.memory_space<vmem>>, vector<128x128xbf16>
    %1 = arith.extf %0 : vector<128x128xbf16> to vector<128x128xf32>
    %cst = arith.constant dense<0.000000e+00> : vector<128xf32>
    %2 = vector.multi_reduction <add>, %1, %cst [1] : vector<128x128xf32> to vector<128xf32>
    %3 = vector.shape_cast %2 : vector<128xf32> to vector<128x1xf32>
    %4 = arith.mulf %1, %1 : vector<128x128xf32>
    %cst_1 = arith.constant dense<0.000000e+00> : vector<128xf32>
    %5 = vector.multi_reduction <add>, %4, %cst_1 [1] : vector<128x128xf32> to vector<128xf32>
    %6 = vector.shape_cast %5 : vector<128xf32> to vector<128x1xf32>
    %cst_2 = arith.constant 7.812500e-03 : f32
    %7 = vector.broadcast %cst_2 : f32 to vector<128x1xf32>
    %8 = arith.mulf %3, %7 : vector<128x1xf32>
    %cst_3 = arith.constant 7.812500e-03 : f32
    %9 = vector.broadcast %cst_3 : f32 to vector<128x1xf32>
    %10 = arith.mulf %6, %9 : vector<128x1xf32>
    %11 = arith.mulf %8, %8 : vector<128x1xf32>
    %12 = arith.subf %10, %11 : vector<128x1xf32>
    %cst_4 = arith.constant 0.000000e+00 : f32
    %13 = vector.broadcast %cst_4 : f32 to vector<128x1xf32>
    %14 = arith.maximumf %12, %13 : vector<128x1xf32>
    %cst_5 = arith.constant 9.99999974E-6 : f32
    %15 = vector.broadcast %cst_5 : f32 to vector<128x1xf32>
    %16 = arith.addf %14, %15 : vector<128x1xf32>
    %17 = math.rsqrt %16 : vector<128x1xf32>
    %18 = vector.broadcast %8 : vector<128x1xf32> to vector<128x128xf32>
    %19 = arith.subf %1, %18 : vector<128x128xf32>
    %20 = vector.broadcast %17 : vector<128x1xf32> to vector<128x128xf32>
    %21 = arith.mulf %19, %20 : vector<128x128xf32>
    %c0_6 = arith.constant 0 : index
    %c0_7 = arith.constant 0 : index
    %22 = vector.load %arg2[%c0_6, %c0_7] : memref<1x128xf32, #tpu.memory_space<vmem>>, vector<1x128xf32>
    %23 = vector.broadcast %22 : vector<1x128xf32> to vector<128x128xf32>
    %24 = arith.mulf %21, %23 : vector<128x128xf32>
    %c0_8 = arith.constant 0 : index
    %c0_9 = arith.constant 0 : index
    %25 = vector.load %arg3[%c0_8, %c0_9] : memref<1x128xf32, #tpu.memory_space<vmem>>, vector<1x128xf32>
    %26 = vector.broadcast %25 : vector<1x128xf32> to vector<128x128xf32>
    %27 = arith.addf %24, %26 : vector<128x128xf32>
    %28 = arith.truncf %27 : vector<128x128xf32> to vector<128x128xbf16>
    %c0_10 = arith.constant 0 : index
    %c0_11 = arith.constant 0 : index
    %29 = vector.load %arg4[%c0_10, %c0_11] : memref<128x128xbf16, #tpu.memory_space<vmem>>, vector<128x128xbf16>
    %cst_12 = arith.constant dense<0.000000e+00> : vector<128x128xf32>
    %30 = tpu.matmul %28, %29, %cst_12 {dimension_numbers = #tpu.dot_dimension_numbers<[1], [0], [0], [1], [0, 0, 1, 1], [], []>} : vector<128x128xbf16>, vector<128x128xbf16>, vector<128x128xf32> -> vector<128x128xf32>
    %c0_13 = arith.constant 0 : index
    %c0_14 = arith.constant 0 : index
    %31 = vector.load %arg5[%c0_13, %c0_14] : memref<1x128xf32, #tpu.memory_space<vmem>>, vector<1x128xf32>
    %32 = vector.broadcast %31 : vector<1x128xf32> to vector<128x128xf32>
    %33 = arith.addf %30, %32 : vector<128x128xf32>
    %c0_15 = arith.constant 0 : index
    %c0_16 = arith.constant 0 : index
    %34 = vector.load %arg1[%c0_15, %c0_16] : memref<128x128xbf16, #tpu.memory_space<vmem>>, vector<128x128xbf16>
    %35 = arith.extf %34 : vector<128x128xbf16> to vector<128x128xf32>
    %36 = arith.addf %35, %33 : vector<128x128xf32>
    %37 = arith.truncf %36 : vector<128x128xf32> to vector<128x128xbf16>
    %c0_17 = arith.constant 0 : index
    %c0_18 = arith.constant 0 : index
    %38 = vector.load %arg6[%c0_17, %c0_18] : memref<128x128xbf16, #tpu.memory_space<vmem>>, vector<128x128xbf16>
    tpu.vector_store %arg6[%c0_17, %c0_18], %37 {strides = array<i32>} : memref<128x128xbf16, #tpu.memory_space<vmem>>, vector<128x128xbf16>,
    return
  }
  func.func @transform_0(%arg0: i32) -> (i32, i32) {
    %c0_i32 = arith.constant 0 : i32
    %c0_i32_0 = arith.constant 0 : i32
    return %arg0, %c0_i32 : i32, i32
  }
  func.func @transform_1(%arg0: i32) -> (i32, i32) {
    %c0_i32 = arith.constant 0 : i32
    %c0_i32_0 = arith.constant 0 : i32
    %c0_i32_1 = arith.constant 0 : i32
    return %c0_i32, %c0_i32_0 : i32, i32
  }
  func.func @transform_2(%arg0: i32) -> (i32, i32) {
    %c0_i32 = arith.constant 0 : i32
    %c0_i32_0 = arith.constant 0 : i32
    %c0_i32_1 = arith.constant 0 : i32
    return %c0_i32, %c0_i32_0 : i32, i32
  }
  func.func @transform_3(%arg0: i32) -> (i32, i32) {
    %c0_i32 = arith.constant 0 : i32
    %c0_i32_0 = arith.constant 0 : i32
    %c0_i32_1 = arith.constant 0 : i32
    return %c0_i32, %c0_i32_0 : i32, i32
  }
  func.func @transform_4(%arg0: i32) -> (i32, i32) {
    %c0_i32 = arith.constant 0 : i32
    %c0_i32_0 = arith.constant 0 : i32
    %c0_i32_1 = arith.constant 0 : i32
    return %c0_i32, %c0_i32_0 : i32, i32
  }
  func.func @transform_5(%arg0: i32) -> (i32, i32) {
    %c0_i32 = arith.constant 0 : i32
    %c0_i32_0 = arith.constant 0 : i32
    return %arg0, %c0_i32 : i32, i32
  }
}

</mosaic_0001>

<bundles_post_ra>
// kernel: tpu_custom_call.1
= control target key start
LH: loop header
LB: loop body
LE: loop exit
PB: predicated region body
PF: predicated region fallthrough
CT: control target
= control target key end

     0   :  { %10 = vsyncpa [#allocation3], 0  ;;  %s1850_s0 = inlined_call_operand.hbm [shape: bf16[256,128], index: 0, kind: input, shape index: {}]   ;;  %s1851_s1 = inlined_call_operand.vmem [shape: f32[1,128], index: 1, kind: input, shape index: {}]   ;;  %s1852_s2 = inlined_call_operand.vmem [shape: f32[1,128], index: 2, kind: input, shape index: {}]   ;;  %s1853_s3 = inlined_call_operand.hbm [shape: bf16[128,128], index: 3, kind: input, shape index: {}]   ;;  %s1854_s4 = inlined_call_operand.vmem [shape: f32[1,128], index: 4, kind: input, shape index: {}]   ;;  %s1855_s5 = inlined_call_operand.hbm [shape: bf16[256,128], index: 5, kind: output, shape index: {}]  }
   0x1   :  { %12 = vsyncpa [#allocation3 + $0x1], 0 }
   0x2   :  { %13 = vsyncpa [#allocation6], 0 }
   0x3   :  { %14 = vsyncpa [#allocation4], 0 }
   0x4   :  { %16 = vsyncpa [#allocation4 + $0x1], 0  ;;  %s1405_s18 = smov 0   ;;  %s1407_s19 = smov 0  }
   0x5   :  { %s1409_s20 = smov 0   ;;  %s1411_s21 = smov 0  }
   0x6 LB: > { %s1426_s22 = sadd.s32 4294967295, %s1366_s21   ;;  %s932_s23 = sadd.s32 4294967294, %s1366_s21   ;;  %s1366_s21 = sphi %s1411_s21, %s1879_s21   ;;  %s1362_s20 = sphi %s1409_s20, %s1878_s20   ;;  %s1358_s19 = sphi %s1407_s19, %s1877_s19   ;;  %s1354_s18 = sphi %s1405_s18, %s1876_s18  }
   0x7   : > { %p42_p0 = scmp.ne.s32.totalorder %s1358_s19, %s1354_s18  ;;  %p1856_p1 = scmp.eq.s32.totalorder %s1426_s22, 0 }
   0x8   : > { %p156_p3 = scmp.eq.s32.totalorder %s932_s23, 1  ;;  %p933_p5 = scmp.ge.s32.totalorder %s1366_s21, 1 }
   0x9   : > { %p1435_p4 = por %p1856_p1, %p42_p0  ;;  %p163_p7 = scmp.lt.s32.totalorder %s1366_s21, 3 }
   0xa   : > { %p1440_p6 = por %p156_p3, %p42_p0  ;;  %s1368_s27 = smov [#allocation5]  }
   0xb   : > { %s1861_s24 = scalar_select %p1435_p4, 1, 0 }
   0xc   : > { %s1862_s25 = scalar_select %p1440_p6, 1, 0 }
   0xd   : > { %p1445_p8 = pnand %p933_p5, %p163_p7  ;;  %s181_s28 = sshll.u32 %s1368_s27, 4  ;;  %s182_s28 = int_to_ptr.vmem [resolvable:$true] %s181_s28 }
   0xe   : > { %s1459_s30 = sadd.s32 1, %s1366_s21   ;;  %s29_s6 = sadd.s32 1, %s1362_s20 }
   0xf   : > { %s1863_s26 = scalar_select %p1445_p8, 1, 0 }
  0x10   : > { %p1151_p9 = pneg %p1445_p8  ;;  %s26_s7 = ssub.s32 %s1366_s21, %s1459_s30 }
  0x11   : > { %s1255_s8 = scalar_lea.vmem %s182_s28, 1024  ;;  %p1263_p5 = scmp.lt.s32.totalorder %s182_s28, %s182_s28 }
  0x12   : > { %p1454_p11 = pnand %p1151_p9, %p1856_p1  ;;  %p1256_p13 = scmp.ne.s32.totalorder %s182_s28, %s1255_s8 }
  0x13   : > { %p1264_p7 = scmp.lt.s32.totalorder %s1255_s8, %s1255_s8 }
  0x14   : > { %p1246_p12 = pneg %p1454_p11 }
  0x15   : > { %p1265_p10 = por %p1264_p7, %p1263_p5 }
  0x16   : > { %p1258_p0 = pnand %p1256_p13, %p1246_p12 }
  0x18   : > { %p1259_p3 = pneg %p1258_p0 }
  0x1a   : > { %p1266_p2 = pnand %p1265_p10, %p1259_p3 }
  0x1c   : > { %1269 = shalt.err (!%p1266_p2)
}
  0x1d   : > { %s1857_s9 = smov 64   ;;  %s1370_s10 = smov 4  }
  0x1e   : > { %1154 = dma.hbm_to_vmem [thread:$0]  (!%p1454_p11), %s1853_s3, 1024, %s182_s28, [#allocation6], %s1857_s9, %s1857_s9, %s1370_s10  }
  0x1f   : > { %p27_p2 = scmp.eq.s32.totalorder %s26_s7, 0  ;;  %p36_p9 = scmp.ne.s32.totalorder %s1362_s20, %s1358_s19 }
  0x20   : > { %p37_p10 = scmp.eq.s32.totalorder %s1366_s21, 0  ;;  %p1164_p12 = scmp.lt.s32.totalorder %s1366_s21, 2 }
  0x21   : > { %s1479_s13 = scalar_select %p27_p2, %s1362_s20, %s29_s6  }
  0x22   : > { %p38_p13 = por %p37_p10, %p36_p9  ;;  %p1865_p0 = scmp.eq.s32.totalorder %s1426_s22, 1 }
  0x23   : > { %s198_s15 = sand.u32 1, %s1362_s20   ;;  %s975_s16 = sshll.u32 %s1366_s21, 10 }
  0x24   : > { %p1483_p3 = por %p1865_p0, %p36_p9  ;;  %s936_s17 = sshll.u32 %s198_s15, 6 }
  0x25   : > { %s1492_s29 = scalar_lea.hbm %s1850_s0, %s975_s16  ;;  %s202_s28 = scalar_lea.vmem [#allocation2], %s936_s17 }
  0x26   : > { %s1866_s14 = scalar_select %p1483_p3, 1, 0 }
  0x27   : > { %s209_s6 = sshll.u32 %s202_s28, 4  ;;  %p1494_p11 = pnand %p1164_p12, %p38_p13  ;;  %s1498_s6 = int_to_ptr.vmem [resolvable:$true] %s209_s6 }
  0x28   : > { %s1500_s8 = scalar_lea.sflag [#allocation3], %s198_s15  ;;  %s1270_s11 = scalar_lea.hbm %s1492_s29, 1024 }
  0x29   : > { %p1271_p5 = scmp.ne.s32.totalorder %s1492_s29, %s1270_s11  ;;  %p1272_p7 = pneg %p1494_p11 }
  0x2a   : > { %s1275_s17 = scalar_lea.hbm %s1850_s0, 2048  ;;  %p1276_p10 = scmp.lt.s32.totalorder %s1492_s29, %s1850_s0 }
  0x2b   : > { %p1273_p2 = pnand %p1272_p7, %p1271_p5  ;;  %p1277_p12 = scmp.lt.s32.totalorder %s1275_s17, %s1270_s11 }
  0x2d   : > { %p1274_p9 = pneg %p1273_p2  ;;  %p1278_p13 = por %p1277_p12, %p1276_p10 }
  0x2f   : > { %p1279_p0 = pnand %p1278_p13, %p1274_p9 }
  0x31   : > { %1282 = shalt.err (!%p1279_p0)
}
  0x32   : > { %s1283_s15 = scalar_lea.vmem %s1498_s6, 1024  ;;  %s1371_s28 = smov [#allocation2]  }
  0x33   : > { %p1284_p1 = scmp.ne.s32.totalorder %s1498_s6, %s1283_s15  ;;  %s1288_s9 = sshll.u32 %s1371_s28, 4  ;;  %s1289_s9 = int_to_ptr.vmem [resolvable:$false] %s1288_s9 }
  0x34   : > { %s1290_s12 = scalar_lea.vmem %s1289_s9, 2048  ;;  %p1291_p2 = scmp.lt.s32.totalorder %s1498_s6, %s1289_s9 }
  0x35   : > { %p1286_p6 = pnand %p1284_p1, %p1272_p7  ;;  %p1292_p3 = scmp.lt.s32.totalorder %s1290_s12, %s1283_s15 }
  0x37   : > { %p1287_p5 = pneg %p1286_p6  ;;  %p1293_p4 = por %p1292_p3, %p1291_p2 }
  0x39   : > { %p1294_p8 = pnand %p1293_p4, %p1287_p5 }
  0x3b   : > { %1297 = shalt.err (!%p1294_p8)
}
  0x3c   : > { %s1868_s11 = smov 64   ;;  %p1869_p1 = scmp.ne.s32.totalorder %s1863_s26, 0 }
  0x3d   : > { %1158 = dma.hbm_to_vmem [thread:$0]  (!%p1494_p11), %s1492_s29, 1024, %s1498_s6, %s1500_s8, %s1868_s11, %s1868_s11, %s1370_s10  }
  0x3e   : > { %221 = sbr.rel (%p1869_p1) target bundleno = 522 (0x20a), region = 40  ;;  %s1527_s16 = sand.u32 (!%p1869_p1), 1, %s1358_s19  }
  0x3f   : > { %s940_s9 = sshll.u32 (!%p1869_p1), %s1527_s16, 6  ;;  %s224_s17 = scalar_lea.sflag (!%p1869_p1), [#allocation3], %s1527_s16 }
  0x40   : > { %s1533_s7 = scalar_lea.vmem (!%p1869_p1), [#allocation2], %s940_s9  ;;  %p1870_p4 = scmp.ne.s32.totalorder (!%p1869_p1), %s1861_s24, 0 }
  0x43   : > { %1341 = dma.done.wait (%p1870_p4), %s224_s17, 1024  }
  0x44   : > { %1343 = vsyncadd (%p1870_p4), %s224_s17, 4294966272  ;;  %p1871_p6 = scmp.eq.s32.totalorder %s1426_s22, 0 }
  0x46   : > { %1345 = dma.done.wait (%p1871_p6), [#allocation6], 1024   ;;  %p1872_p8 = pmov %p1871_p6 }
  0x47   : > { %v1068_v0 = vld [vmem:[%s1533_s7 + $0x20] sm:$0xff]   ;;  %v1065_v4 = vld [vmem:[%s1533_s7 + $0x8] sm:$0xff]   ;;  %v1066_v20 = vld [vmem:[%s1533_s7 + $0x10] sm:$0xff]   ;;  %s1778_s23 = scalar_lea.vmem [#allocation7], %s940_s9  ;;  %s992_s27 = sshll.u32 %s1426_s22, 10 }
  0x48   : > { %1347 = vsyncadd (%p1872_p8), [#allocation6], 4294966272  ;;  %v994_v1 = vld [vmem:[%s1533_s7] sm:$0xff]   ;;  %v1545_v2 = vunpack.c.l.bf16 %v1068_v0  ;;  %v1552_v5 = vunpack.c.h.bf16 %v1068_v0  ;;  %v1558_v7 = vunpack.c.h.bf16 %v1065_v4  ;;  %v1560_v8 = vunpack.c.l.bf16 %v1065_v4  ;;  %v1069_v9 = vld [vmem:[%s1533_s7 + $0x28] sm:$0xff]   ;;  %s849_s15 = sshll.u32 %s1778_s23, 4  ;;  %s1803_s11 = scalar_lea.hbm %s1855_s5, %s992_s27  ;;  %s1805_s15 = int_to_ptr.vmem [resolvable:$true] %s849_s15 }
  0x49   : > { %v1547_v3 = vunpack.c.l.bf16 %v994_v1  ;;  %v1554_v6 = vunpack.c.h.bf16 %v994_v1  ;;  %v1565_v10 = vunpack.c.h.bf16 %v1069_v9  ;;  %v1567_v11 = vunpack.c.l.bf16 %v1069_v9  ;;  %v1070_v23 = vld [vmem:[%s1533_s7 + $0x30] sm:$0xff]   ;;  %v1204_v24 = vld [vmem:[#allocation5 + $0x38] sm:$0xff]   ;;  %v1206_v32 = vld [vmem:[#allocation5 + $0x28] sm:$0xff]   ;;  %s836_s22 = scalar_lea.sflag [#allocation4], %s1527_s16  ;;  %s1298_s9 = scalar_lea.vmem %s1805_s15, 1024 }
  0x4a   : > { %309 = vadd.xlane.f32.xlu1 %v1545_v2  ;;  %v334_v14 = vmul.f32 %v1552_v5, %v1552_v5  ;;  %v333_v15 = vmul.f32 %v1545_v2, %v1545_v2  ;;  %v328_v16 = vmul.f32 %v1558_v7, %v1558_v7  ;;  %v327_v17 = vmul.f32 %v1560_v8, %v1560_v8  ;;  %v1067_v27 = vld [vmem:[%s1533_s7 + $0x18] sm:$0xff]   ;;  %v1205_v28 = vld [vmem:[#allocation5 + $0x30] sm:$0xff]   ;;  %v1207_v35 = vld [vmem:[#allocation5 + $0x20] sm:$0xff]   ;;  %p1299_p3 = scmp.ne.s32.totalorder %s1805_s15, %s1298_s9  ;;  %p1873_p11 = scmp.ne.s32.totalorder %s1866_s14, 0 }
  0x4b   : > { %293 = vadd.xlane.f32.xlu0 %v1547_v3  ;;  %v326_v12 = vmul.f32 %v1554_v6, %v1554_v6  ;;  %v325_v13 = vmul.f32 %v1547_v3, %v1547_v3  ;;  %v336_v18 = vmul.f32 %v1565_v10, %v1565_v10  ;;  %v335_v19 = vmul.f32 %v1567_v11, %v1567_v11  ;;  %v1071_v31 = vld [vmem:[%s1533_s7 + $0x38] sm:$0xff]   ;;  %v1209_v41 = vld [vmem:[#allocation5 + $0x10] sm:$0xff]   ;;  %v1210_v44 = vld [vmem:[#allocation5 + $0x8] sm:$0xff]   ;;  %s1372_s17 = smov [#allocation7]  }
  0x4c   : > { %v1588_v21 = vunpack.c.h.bf16 %v1066_v20  ;;  %v1590_v22 = vunpack.c.l.bf16 %v1066_v20  ;;  %v1595_v25 = vunpack.c.h.bf16 %v1070_v23  ;;  %v1597_v26 = vunpack.c.l.bf16 %v1070_v23  ;;  %1095 = vmatprep.subr.bf16.mxu0 %v1204_v24  ;;  %1127 = vmatprep.subr.bf16.mxu1 %v1204_v24  ;;  %v1208_v38 = vld [vmem:[#allocation5 + $0x18] sm:$0xff]   ;;  %v1211_v47 = vld [vmem:[#allocation5] sm:$0xff]   ;;  %p1300_p7 = pnand %p1299_p3, %p1873_p11  ;;  %s1302_s7 = sshll.u32 %s1372_s17, 4  ;;  %s1303_s7 = int_to_ptr.vmem [resolvable:$false] %s1302_s7 }
  0x4d   : > { %1096 = vmatpush3.bf16.msra.mxu0 %v1204_v24  ;;  %1135 = vmatpush3.bf16.msra.mxu1 %v1204_v24  ;;  %v1602_v29 = vunpack.c.h.bf16 %v1067_v27  ;;  %v1604_v30 = vunpack.c.l.bf16 %v1067_v27  ;;  %v1609_v33 = vunpack.c.h.bf16 %v1071_v31  ;;  %v1611_v34 = vunpack.c.l.bf16 %v1071_v31  ;;  %s1304_s24 = scalar_lea.vmem %s1303_s7, 2048  ;;  %p1305_p10 = scmp.lt.s32.totalorder %s1805_s15, %s1303_s7 }
  0x4e   : > { %311 = vadd.xlane.f32.xlu1 %v1552_v5  ;;  %1097 = vmatprep.subr.bf16.mxu0 %v1205_v28  ;;  %v330_v36 = vmul.f32 %v1588_v21, %v1588_v21  ;;  %v329_v37 = vmul.f32 %v1590_v22, %v1590_v22  ;;  %v338_v39 = vmul.f32 %v1595_v25, %v1595_v25  ;;  %p1301_p9 = pneg %p1300_p7  ;;  %p1306_p12 = scmp.lt.s32.totalorder %s1304_s24, %s1298_s9 }
  0x4f   : > { %295 = vadd.xlane.f32.xlu0 %v1554_v6  ;;  %1128 = vmatprep.subr.bf16.mxu1 %v1205_v28  ;;  %v337_v40 = vmul.f32 %v1597_v26, %v1597_v26  ;;  %v332_v42 = vmul.f32 %v1602_v29, %v1602_v29  ;;  %v331_v43 = vmul.f32 %v1604_v30, %v1604_v30 }
  0x50   : > { %v340_v45 = vmul.f32 %v1609_v33, %v1609_v33  ;;  %v339_v46 = vmul.f32 %v1611_v34, %v1611_v34  ;;  %p1307_p13 = por %p1306_p12, %p1305_p10 }
  0x51   : > { %1098 = vmatpush3.bf16.msra.mxu0 %v1205_v28  ;;  %1136 = vmatpush3.bf16.msra.mxu1 %v1205_v28 }
  0x52   : > { %299 = vadd.xlane.f32.xlu1 %v1558_v7  ;;  %1099 = vmatprep.subr.bf16.mxu0 %v1206_v32  ;;  %p1308_p0 = pnand %p1307_p13, %p1301_p9 }
  0x53   : > { %297 = vadd.xlane.f32.xlu0 %v1560_v8  ;;  %1129 = vmatprep.subr.bf16.mxu1 %v1206_v32 }
  0x55   : > { %1100 = vmatpush3.bf16.msra.mxu0 %v1206_v32  ;;  %1137 = vmatpush3.bf16.msra.mxu1 %v1206_v32 }
  0x56   : > { %315 = vadd.xlane.f32.xlu1 %v1565_v10  ;;  %1101 = vmatprep.subr.bf16.mxu0 %v1207_v35 }
  0x57   : > { %313 = vadd.xlane.f32.xlu0 %v1567_v11  ;;  %1130 = vmatprep.subr.bf16.mxu1 %v1207_v35 }
  0x59   : > { %1102 = vmatpush3.bf16.msra.mxu0 %v1207_v35  ;;  %1138 = vmatpush3.bf16.msra.mxu1 %v1207_v35 }
  0x5a   : > { %343 = vadd.xlane.f32.xlu1 %v326_v12  ;;  %1103 = vmatprep.subr.bf16.mxu0 %v1208_v38 }
  0x5b   : > { %341 = vadd.xlane.f32.xlu0 %v325_v13  ;;  %1131 = vmatprep.subr.bf16.mxu1 %v1208_v38 }
  0x5d   : > { %1104 = vmatpush3.bf16.msra.mxu0 %v1208_v38  ;;  %1139 = vmatpush3.bf16.msra.mxu1 %v1208_v38 }
  0x5e   : > { %359 = vadd.xlane.f32.xlu1 %v334_v14  ;;  %1105 = vmatprep.subr.bf16.mxu0 %v1209_v41 }
  0x5f   : > { %357 = vadd.xlane.f32.xlu0 %v333_v15  ;;  %1132 = vmatprep.subr.bf16.mxu1 %v1209_v41 }
  0x61   : > { %1106 = vmatpush3.bf16.msra.mxu0 %v1209_v41  ;;  %1140 = vmatpush3.bf16.msra.mxu1 %v1209_v41 }
  0x62   : > { %347 = vadd.xlane.f32.xlu1 %v328_v16  ;;  %1107 = vmatprep.subr.bf16.mxu0 %v1210_v44 }
  0x63   : > { %345 = vadd.xlane.f32.xlu0 %v327_v17  ;;  %1133 = vmatprep.subr.bf16.mxu1 %v1210_v44 }
  0x65   : > { %1108 = vmatpush3.bf16.msra.mxu0 %v1210_v44  ;;  %1141 = vmatpush3.bf16.msra.mxu1 %v1210_v44 }
  0x66   : > { %363 = vadd.xlane.f32.xlu1 %v336_v18  ;;  %1109 = vmatprep.subr.bf16.mxu0 %v1211_v47 }
  0x67   : > { %361 = vadd.xlane.f32.xlu0 %v335_v19  ;;  %1134 = vmatprep.subr.bf16.mxu1 %v1211_v47 }
  0x69   : > { %1110 = vmatpush3.bf16.msra.mxu0 %v1211_v47  ;;  %1142 = vmatpush3.bf16.msra.mxu1 %v1211_v47 }
  0x6a   : > { %303 = vadd.xlane.f32.xlu1 %v1588_v21 }
  0x6b   : > { %301 = vadd.xlane.f32.xlu0 %v1590_v22 }
  0x6e   : > { %319 = vadd.xlane.f32.xlu1 %v1595_v25 }
  0x6f   : > { %317 = vadd.xlane.f32.xlu0 %v1597_v26 }
  0x72   : > { %307 = vadd.xlane.f32.xlu1 %v1602_v29 }
  0x73   : > { %305 = vadd.xlane.f32.xlu0 %v1604_v30 }
  0x76   : > { %323 = vadd.xlane.f32.xlu1 %v1609_v33 }
  0x77   : > { %321 = vadd.xlane.f32.xlu0 %v1611_v34 }
  0x7a   : > { %351 = vadd.xlane.f32.xlu1 %v330_v36 }
  0x7b   : > { %349 = vadd.xlane.f32.xlu0 %v329_v37 }
  0x7e   : > { %367 = vadd.xlane.f32.xlu1 %v338_v39 }
  0x7f   : > { %365 = vadd.xlane.f32.xlu0 %v337_v40 }
  0x82   : > { %355 = vadd.xlane.f32.xlu1 %v332_v42 }
  0x83   : > { %353 = vadd.xlane.f32.xlu0 %v331_v43 }
  0x86   : > { %371 = vadd.xlane.f32.xlu1 %v340_v45 }
  0x87   : > { %369 = vadd.xlane.f32.xlu0 %v339_v46 }
  0xd3   : > { %v310_v48 = vpop.xlane.xlu1 %309 }
  0xd4   : > { %v294_v49 = vpop.xlane.xlu0 %293  ;;  %v1635_v58 = vmul.f32 0.0078125, %v310_v48 }
  0xd5   : > { %v1631_v56 = vmul.f32 0.0078125, %v294_v49 }
  0xd6   : > { %v413_v12 = vmul.f32 %v1635_v58, %v1635_v58 }
  0xd7   : > { %v312_v50 = vpop.xlane.xlu1 %311  ;;  %v405_v62 = vmul.f32 %v1631_v56, %v1631_v56 }
  0xd8   : > { %v296_v51 = vpop.xlane.xlu0 %295  ;;  %v1637_v59 = vmul.f32 0.0078125, %v312_v50 }
  0xd9   : > { %v1633_v57 = vmul.f32 0.0078125, %v296_v51 }
  0xda   : > { %v414_v13 = vmul.f32 %v1637_v59, %v1637_v59 }
  0xdb   : > { %v300_v52 = vpop.xlane.xlu1 %299  ;;  %v406_v63 = vmul.f32 %v1633_v57, %v1633_v57 }
  0xdc   : > { %v298_v53 = vpop.xlane.xlu0 %297  ;;  %v1647_v14 = vmul.f32 0.0078125, %v300_v52 }
  0xdd   : > { %v1649_v23 = vmul.f32 0.0078125, %v298_v53 }
  0xde   : > { %v408_v32 = vmul.f32 %v1647_v14, %v1647_v14 }
  0xdf   : > { %v316_v54 = vpop.xlane.xlu1 %315  ;;  %v407_v42 = vmul.f32 %v1649_v23, %v1649_v23 }
  0xe0   : > { %v314_v55 = vpop.xlane.xlu0 %313  ;;  %v1653_v35 = vmul.f32 0.0078125, %v316_v54 }
  0xe1   : > { %v1655_v36 = vmul.f32 0.0078125, %v314_v55 }
  0xe2   : > { %v416_v47 = vmul.f32 %v1653_v35, %v1653_v35 }
  0xe3   : > { %v344_v60 = vpop.xlane.xlu1 %343  ;;  %v415_v48 = vmul.f32 %v1655_v36, %v1655_v36 }
  0xe4   : > { %v342_v61 = vpop.xlane.xlu0 %341  ;;  %v390_v0 = vmul.f32 0.0078125, %v344_v60 }
  0xe5   : > { %v389_v1 = vmul.f32 0.0078125, %v342_v61 }
  0xe6   : > { %v422_v4 = vsub.f32 %v390_v0, %v406_v63 }
  0xe7   : > { %v421_v9 = vsub.f32 %v389_v1, %v405_v62  ;;  %v360_v15 = vpop.xlane.xlu1 %359 }
  0xe8   : > { %v358_v16 = vpop.xlane.xlu0 %357  ;;  %v438_v17 = vmax.f32 %v422_v4, 0.0  ;;  %v398_v19 = vmul.f32 0.0078125, %v360_v15 }
  0xe9   : > { %v437_v18 = vmax.f32 %v421_v9, 0.0  ;;  %v397_v20 = vmul.f32 0.0078125, %v358_v16 }
  0xea   : > { %v454_v24 = vadd.f32 1e-05, %v438_v17  ;;  %v430_v28 = vsub.f32 %v398_v19, %v414_v13  ;;  %v486_v19 = vsub.f32 %v1554_v6, %v1633_v57  ;;  %v493_v57 = vsub.f32 %v1545_v2, %v1635_v58 }
  0xeb   : > { %v453_v27 = vadd.f32 1e-05, %v437_v18  ;;  %v429_v31 = vsub.f32 %v397_v20, %v413_v12  ;;  %v348_v37 = vpop.xlane.xlu1 %347  ;;  %v485_v18 = vsub.f32 %v1547_v3, %v1631_v56  ;;  %v488_v58 = vsub.f32 %v1558_v7, %v1647_v14 }
  0xec   : > { %v346_v38 = vpop.xlane.xlu0 %345  ;;  %1212 = vrsqrt.f32 %v454_v24  ;;  %v446_v39 = vmax.f32 %v430_v28, 0.0  ;;  %v392_v41 = vmul.f32 0.0078125, %v348_v37  ;;  %v1670_v24 = vld [vmem:[%s1851_s1] ss:$0 sm:$0xff]  ;;  %v495_v14 = vsub.f32 %v1567_v11, %v1655_v36 }
  0xed   : > { %v445_v40 = vmax.f32 %v429_v31, 0.0  ;;  %1214 = vrsqrt.f32 %v453_v27  ;;  %v391_v43 = vmul.f32 0.0078125, %v346_v38  ;;  %v1675_v37 = vld [vmem:[%s1852_s2] ss:$0 sm:$0xff]  ;;  %v494_v38 = vsub.f32 %v1552_v5, %v1637_v59 }
  0xee   : > { %v462_v44 = vadd.f32 1e-05, %v446_v39  ;;  %v424_v46 = vsub.f32 %v392_v41, %v408_v32 }
  0xef   : > { %v461_v45 = vadd.f32 1e-05, %v445_v40  ;;  %v423_v49 = vsub.f32 %v391_v43, %v407_v42  ;;  %v364_v50 = vpop.xlane.xlu1 %363 }
  0xf0   : > { %v362_v51 = vpop.xlane.xlu0 %361  ;;  %1216 = vrsqrt.f32 %v462_v44  ;;  %v440_v52 = vmax.f32 %v424_v46, 0.0  ;;  %v400_v53 = vmul.f32 0.0078125, %v364_v50 }
  0xf1   : > { %v399_v54 = vmul.f32 0.0078125, %v362_v51  ;;  %1218 = vrsqrt.f32 %v461_v45  ;;  %v439_v55 = vmax.f32 %v423_v49, 0.0  ;;  %v487_v51 = vsub.f32 %v1560_v8, %v1649_v23 }
  0xf2   : > { %v456_v60 = vadd.f32 1e-05, %v440_v52  ;;  %v432_v61 = vsub.f32 %v400_v53, %v416_v47 }
  0xf3   : > { %v431_v62 = vsub.f32 %v399_v54, %v415_v48  ;;  %v455_v63 = vadd.f32 1e-05, %v439_v55  ;;  %v304_v0 = vpop.xlane.xlu1 %303 }
  0xf4   : > { %v302_v1 = vpop.xlane.xlu0 %301  ;;  %1220 = vrsqrt.f32 %v456_v60  ;;  %v448_v4 = vmax.f32 %v432_v61, 0.0  ;;  %v1683_v42 = vmul.f32 0.0078125, %v304_v0  ;;  %v496_v60 = vsub.f32 %v1565_v10, %v1653_v35 }
  0xf5   : > { %v447_v9 = vmax.f32 %v431_v62, 0.0  ;;  %1222 = vrsqrt.f32 %v455_v63  ;;  %v1689_v49 = vmul.f32 0.0078125, %v302_v1 }
  0xf6   : > { %v464_v12 = vadd.f32 1e-05, %v448_v4  ;;  %v410_v61 = vmul.f32 %v1683_v42, %v1683_v42 }
  0xf7   : > { %v463_v13 = vadd.f32 1e-05, %v447_v9  ;;  %v320_v15 = vpop.xlane.xlu1 %319  ;;  %v409_v35 = vmul.f32 %v1689_v49, %v1689_v49 }
  0xf8   : > { %v318_v16 = vpop.xlane.xlu0 %317  ;;  %1224 = vrsqrt.f32 %v464_v12  ;;  %v1691_v59 = vmul.f32 0.0078125, %v320_v15 }
  0xf9   : > { %v1213_v17 = vpop.eup %1212  ;;  %1226 = vrsqrt.f32 %v463_v13  ;;  %v1703_v62 = vmul.f32 0.0078125, %v318_v16 }
  0xfa   : > { %v1215_v20 = vpop.eup %1214  ;;  %v502_v32 = vmul.f32 %v1213_v17, %v486_v19  ;;  %v418_v36 = vmul.f32 %v1691_v59, %v1691_v59 }
  0xfb   : > { %v308_v27 = vpop.xlane.xlu1 %307  ;;  %v501_v31 = vmul.f32 %v1215_v20, %v485_v18 }
  0xfc   : > { %v306_v28 = vpop.xlane.xlu0 %305  ;;  %v525_v40 = vmul.f32 %v1670_v24, %v502_v32  ;;  %v1711_v16 = vmul.f32 0.0078125, %v308_v27 }
  0xfd   : > { %v1217_v56 = vpop.eup %1216  ;;  %v524_v39 = vmul.f32 %v1670_v24, %v501_v31  ;;  %v417_v31 = vmul.f32 %v1703_v62, %v1703_v62 }
  0xfe   : > { %v1219_v41 = vpop.eup %1218  ;;  %v548_v46 = vadd.f32 %v1675_v37, %v525_v40  ;;  %v510_v48 = vmul.f32 %v1217_v56, %v494_v38  ;;  %v1717_v38 = vmul.f32 0.0078125, %v306_v28 }
  0xff   : > { %v324_v43 = vpop.xlane.xlu1 %323  ;;  %v547_v45 = vadd.f32 %v1675_v37, %v524_v39  ;;  %v509_v47 = vmul.f32 %v1219_v41, %v493_v57 }
 0x100   : > { %v322_v44 = vpop.xlane.xlu0 %321  ;;  %v533_v54 = vmul.f32 %v1670_v24, %v510_v48 }
 0x101   : > { %v1221_v50 = vpop.eup %1220  ;;  %v563_v52 = vpack.c.bf16 %v548_v46, %v547_v45  ;;  %v532_v53 = vmul.f32 %v1670_v24, %v509_v47 }
 0x102   : > { %v1223_v55 = vpop.eup %1222  ;;  %v556_v1 = vadd.f32 %v1675_v37, %v533_v54  ;;  %v504_v9 = vmul.f32 %v1221_v50, %v488_v58  ;;  %v412_v50 = vmul.f32 %v1711_v16, %v1711_v16 }
 0x103   : > { %1111 = vmatprep.mubr.bf16.mxu0 %v563_v52  ;;  %v352_v63 = vpop.xlane.xlu1 %351  ;;  %v555_v0 = vadd.f32 %v1675_v37, %v532_v53  ;;  %v503_v4 = vmul.f32 %v1223_v55, %v487_v51 }
 0x104   : > { %v350_v23 = vpop.xlane.xlu0 %349  ;;  %v394_v12 = vmul.f32 0.0078125, %v352_v63  ;;  %v527_v19 = vmul.f32 %v1670_v24, %v504_v9  ;;  %v1727_v63 = vmul.f32 0.0078125, %v322_v44 }
 0x105   : > { %v393_v13 = vmul.f32 0.0078125, %v350_v23  ;;  %v1225_v15 = vpop.eup %1224  ;;  %v567_v17 = vpack.c.bf16 %v556_v1, %v555_v0  ;;  %v526_v18 = vmul.f32 %v1670_v24, %v503_v4 }
 0x106   : > { %v1227_v20 = vpop.eup %1226  ;;  %v426_v32 = vsub.f32 %v394_v12, %v410_v61  ;;  %v512_v57 = vmul.f32 %v1225_v15, %v496_v60  ;;  %v550_v41 = vadd.f32 %v1675_v37, %v527_v19  ;;  %v1725_v61 = vmul.f32 0.0078125, %v324_v43 }
 0x107   : > { %v425_v56 = vsub.f32 %v393_v13, %v409_v35  ;;  %1119 = vmatprep.mubr.bf16.mxu1 %v567_v17  ;;  %v368_v39 = vpop.xlane.xlu1 %367  ;;  %v549_v27 = vadd.f32 %v1675_v37, %v526_v18  ;;  %v511_v45 = vmul.f32 %v1227_v20, %v495_v14  ;;  %v411_v12 = vmul.f32 %v1717_v38, %v1717_v38 }
 0x108   : > { %v366_v40 = vpop.xlane.xlu0 %365  ;;  %v442_v46 = vmax.f32 %v426_v32, 0.0  ;;  %v402_v48 = vmul.f32 0.0078125, %v368_v39  ;;  %v535_v28 = vmul.f32 %v1670_v24, %v512_v57  ;;  %v420_v17 = vmul.f32 %v1725_v61, %v1725_v61 }
 0x109   : > { %v441_v47 = vmax.f32 %v425_v56, 0.0  ;;  %v401_v58 = vmul.f32 0.0078125, %v366_v40  ;;  %v564_v51 = vpack.c.bf16 %v550_v41, %v549_v27  ;;  %v534_v52 = vmul.f32 %v1670_v24, %v511_v45 }
 0x10a   : > { %v458_v53 = vadd.f32 1e-05, %v442_v46  ;;  %v434_v55 = vsub.f32 %v402_v48, %v418_v36  ;;  %v558_v1 = vadd.f32 %v1675_v37, %v535_v28  ;;  %v419_v18 = vmul.f32 %v1727_v63, %v1727_v63 }
 0x10b   : > { %v457_v54 = vadd.f32 1e-05, %v441_v47  ;;  %v433_v60 = vsub.f32 %v401_v58, %v417_v31  ;;  %1112 = vmatmul.mubr.bf16.vlgmr.msra.gmra.mxu0 %v564_v51  ;;  %v356_v14 = vpop.xlane.xlu1 %355  ;;  %v557_v0 = vadd.f32 %v1675_v37, %v534_v52  ;;  %v489_v52 = vsub.f32 %v1590_v22, %v1689_v49 }
 0x10c   : > { %v354_v23 = vpop.xlane.xlu0 %353  ;;  %1228 = vrsqrt.f32 %v458_v53  ;;  %v450_v4 = vmax.f32 %v434_v55, 0.0  ;;  %v396_v35 = vmul.f32 0.0078125, %v356_v14  ;;  %v498_v55 = vsub.f32 %v1595_v25, %v1691_v59 }
 0x10d   : > { %v449_v9 = vmax.f32 %v433_v60, 0.0  ;;  %1230 = vrsqrt.f32 %v457_v54  ;;  %v395_v36 = vmul.f32 0.0078125, %v354_v23  ;;  %v568_v43 = vpack.c.bf16 %v558_v1, %v557_v0 }
 0x10e   : > { %v466_v13 = vadd.f32 1e-05, %v450_v4  ;;  %v428_v15 = vsub.f32 %v396_v35, %v412_v50  ;;  %v490_v50 = vsub.f32 %v1588_v21, %v1683_v42  ;;  %v497_v23 = vsub.f32 %v1597_v26, %v1703_v62 }
 0x10f   : > { %v465_v44 = vadd.f32 1e-05, %v449_v9  ;;  %v427_v19 = vsub.f32 %v395_v36, %v411_v12  ;;  %1120 = vmatmul.mubr.bf16.vlgmr.msra.gmra.mxu1 %v568_v43  ;;  %v372_v20 = vpop.xlane.xlu1 %371  ;;  %v492_v35 = vsub.f32 %v1602_v29, %v1711_v16  ;;  %v491_v36 = vsub.f32 %v1604_v30, %v1717_v38 }
 0x110   : > { %v370_v31 = vpop.xlane.xlu0 %369  ;;  %1232 = vrsqrt.f32 %v466_v13  ;;  %v444_v32 = vmax.f32 %v428_v15, 0.0  ;;  %v404_v56 = vmul.f32 0.0078125, %v372_v20  ;;  %v500_v16 = vsub.f32 %v1609_v33, %v1725_v61 }
 0x111   : > { %v403_v57 = vmul.f32 0.0078125, %v370_v31  ;;  %1234 = vrsqrt.f32 %v465_v44  ;;  %v443_v39 = vmax.f32 %v427_v19, 0.0  ;;  %v499_v38 = vsub.f32 %v1611_v34, %v1727_v63 }
 0x112   : > { %v460_v40 = vadd.f32 1e-05, %v444_v32  ;;  %v436_v27 = vsub.f32 %v404_v56, %v420_v17 }
 0x113   : > { %v435_v41 = vsub.f32 %v403_v57, %v419_v18  ;;  %v459_v45 = vadd.f32 1e-05, %v443_v39 }
 0x114   : > { %1236 = vrsqrt.f32 %v460_v40  ;;  %v452_v46 = vmax.f32 %v436_v27, 0.0 }
 0x115   : > { %v451_v47 = vmax.f32 %v435_v41, 0.0  ;;  %1238 = vrsqrt.f32 %v459_v45 }
 0x116   : > { %v468_v48 = vadd.f32 1e-05, %v452_v46 }
 0x117   : > { %v467_v58 = vadd.f32 1e-05, %v451_v47 }
 0x118   : > { %1240 = vrsqrt.f32 %v468_v48 }
 0x119   : > { %v1229_v51 = vpop.eup %1228  ;;  %1242 = vrsqrt.f32 %v467_v58  ;;  %v945_v58 = vld [vmem:[%s1854_s4] ss:$0 sm:$0xff] }
 0x11a   : > { %v1231_v28 = vpop.eup %1230  ;;  %v506_v53 = vmul.f32 %v1229_v51, %v490_v50 }
 0x11b   : > { %v505_v54 = vmul.f32 %v1231_v28, %v489_v52 }
 0x11c   : > { %v529_v60 = vmul.f32 %v1670_v24, %v506_v53 }
 0x11d   : > { %v1233_v14 = vpop.eup %1232  ;;  %v528_v42 = vmul.f32 %v1670_v24, %v505_v54 }
 0x11e   : > { %v1235_v0 = vpop.eup %1234  ;;  %v552_v1 = vadd.f32 %v1675_v37, %v529_v60  ;;  %v514_v4 = vmul.f32 %v1233_v14, %v498_v55 }
 0x11f   : > { %v551_v49 = vadd.f32 %v1675_v37, %v528_v42  ;;  %v513_v9 = vmul.f32 %v1235_v0, %v497_v23 }
 0x120   : > { %v537_v59 = vmul.f32 %v1670_v24, %v514_v4 }
 0x121   : > { %v1237_v12 = vpop.eup %1236  ;;  %v565_v43 = vpack.c.bf16 %v552_v1, %v551_v49  ;;  %v536_v62 = vmul.f32 %v1670_v24, %v513_v9 }
 0x122   : > { %v1239_v13 = vpop.eup %1238  ;;  %v560_v44 = vadd.f32 %v1675_v37, %v537_v59  ;;  %v508_v15 = vmul.f32 %v1237_v12, %v492_v35 }
 0x123   : > { %1115 = vmatprep.mubr.bf16.mxu0 %v565_v43  ;;  %v559_v17 = vadd.f32 %v1675_v37, %v536_v62  ;;  %v507_v18 = vmul.f32 %v1239_v13, %v491_v36 }
 0x124   : > { %v531_v19 = vmul.f32 %v1670_v24, %v508_v15 }
 0x125   : > { %v1241_v20 = vpop.eup %1240  ;;  %v569_v31 = vpack.c.bf16 %v560_v44, %v559_v17  ;;  %v530_v32 = vmul.f32 %v1670_v24, %v507_v18 }
 0x126   : > { %v1243_v56 = vpop.eup %1242  ;;  %v554_v57 = vadd.f32 %v1675_v37, %v531_v19  ;;  %v516_v39 = vmul.f32 %v1241_v20, %v500_v16 }
 0x127   : > { %1123 = vmatprep.mubr.bf16.mxu1 %v569_v31  ;;  %v553_v40 = vadd.f32 %v1675_v37, %v530_v32  ;;  %v515_v27 = vmul.f32 %v1243_v56, %v499_v38 }
 0x128   : > { %v539_v41 = vmul.f32 %v1670_v24, %v516_v39 }
 0x129   : > { %v566_v61 = vpack.c.bf16 %v554_v57, %v553_v40  ;;  %v538_v45 = vmul.f32 %v1670_v24, %v515_v27 }
 0x12a   : > { %v562_v46 = vadd.f32 %v1675_v37, %v539_v41 }
 0x12b   : > { %1116 = vmatmul.mubr.bf16.gmra.mxu0 %v566_v61  ;;  %v561_v63 = vadd.f32 %v1675_v37, %v538_v45 }
 0x12d   : > { %v570_v47 = vpack.c.bf16 %v562_v46, %v561_v63 }
 0x12f   : > { %1124 = vmatmul.mubr.bf16.gmra.mxu1 %v570_v47 }
 0x1cb   : > { %v1113_v48 = vpop.f32.mrf.mxu0 }
 0x1cc   : > { %v685_v51 = vadd.f32 %v1113_v48, %v945_v58 }
 0x1cd   : > { %v676_v50 = vpop.f32.mrf.mxu0 }
 0x1ce   : > { %v677_v52 = vadd.f32 %v945_v58, %v676_v50  ;;  %v741_v60 = vadd.f32 %v1560_v8, %v685_v51 }
 0x1cf   : > { %v1114_v28 = vpop.f32.mrf.mxu0  ;;  %v1121_v53 = vpop.f32.mrf.mxu1 }
 0x1d0   : > { %v688_v54 = vadd.f32 %v1114_v28, %v945_v58  ;;  %v717_v14 = vadd.f32 %v1121_v53, %v945_v58  ;;  %v739_v42 = vadd.f32 %v1547_v3, %v677_v52 }
 0x1d1   : > { %v679_v24 = vpop.f32.mrf.mxu0  ;;  %v708_v55 = vpop.f32.mrf.mxu1 }
 0x1d2   : > { %v742_v37 = vadd.f32 %v1558_v7, %v688_v54  ;;  %v680_v23 = vadd.f32 %v945_v58, %v679_v24  ;;  %v709_v49 = vadd.f32 %v945_v58, %v708_v55  ;;  %v749_v7 = vadd.f32 %v1567_v11, %v717_v14 }
 0x1d3   : > { %v1122_v0 = vpop.f32.mrf.mxu1 }
 0x1d4   : > { %v1033_v1 = vpack.c.bf16 %v742_v37, %v741_v60  ;;  %v740_v4 = vadd.f32 %v1554_v6, %v680_v23  ;;  %v720_v9 = vadd.f32 %v1122_v0, %v945_v58  ;;  %v747_v6 = vadd.f32 %v1545_v2, %v709_v49 }
 0x1d5   : > { %v711_v35 = vpop.f32.mrf.mxu1 }
 0x1d6   : > { %1072 = vst [vmem:[%s1778_s23 + $0x8] sm:$0xff] %v1033_v1   ;;  %v1028_v8 = vpack.c.bf16 %v740_v4, %v739_v42  ;;  %v750_v3 = vadd.f32 %v1565_v10, %v720_v9  ;;  %v712_v59 = vadd.f32 %v945_v58, %v711_v35 }
 0x1d8   : > { %1029 = vst [vmem:[%s1778_s23] sm:$0xff] %v1028_v8   ;;  %v1053_v12 = vpack.c.bf16 %v750_v3, %v749_v7  ;;  %v748_v36 = vadd.f32 %v1552_v5, %v712_v59 }
 0x1da   : > { %1076 = vst [vmem:[%s1778_s23 + $0x28] sm:$0xff] %v1053_v12   ;;  %v1048_v43 = vpack.c.bf16 %v748_v36, %v747_v6 }
 0x1dc   : > { %1075 = vst [vmem:[%s1778_s23 + $0x20] sm:$0xff] %v1048_v43  }
 0x1eb   : > { %v1117_v62 = vpop.f32.mrf.mxu0 }
 0x1ec   : > { %v701_v44 = vadd.f32 %v1117_v62, %v945_v58 }
 0x1ed   : > { %v692_v13 = vpop.f32.mrf.mxu0 }
 0x1ee   : > { %v693_v15 = vadd.f32 %v945_v58, %v692_v13  ;;  %v745_v19 = vadd.f32 %v1604_v30, %v701_v44 }
 0x1ef   : > { %v1118_v17 = vpop.f32.mrf.mxu0  ;;  %v1125_v11 = vpop.f32.mrf.mxu1 }
 0x1f0   : > { %v704_v18 = vadd.f32 %v1118_v17, %v945_v58  ;;  %v733_v5 = vadd.f32 %v1125_v11, %v945_v58  ;;  %v743_v38 = vadd.f32 %v1590_v22, %v693_v15 }
 0x1f1   : > { %v695_v16 = vpop.f32.mrf.mxu0  ;;  %v724_v10 = vpop.f32.mrf.mxu1 }
 0x1f2   : > { %v746_v2 = vadd.f32 %v1602_v29, %v704_v18  ;;  %v696_v20 = vadd.f32 %v945_v58, %v695_v16  ;;  %v725_v57 = vadd.f32 %v945_v58, %v724_v10  ;;  %v753_v30 = vadd.f32 %v1611_v34, %v733_v5 }
 0x1f3   : > { %v1126_v31 = vpop.f32.mrf.mxu1 }
 0x1f4   : > { %v1043_v32 = vpack.c.bf16 %v746_v2, %v745_v19  ;;  %v744_v56 = vadd.f32 %v1588_v21, %v696_v20  ;;  %v736_v39 = vadd.f32 %v1126_v31, %v945_v58  ;;  %v751_v22 = vadd.f32 %v1597_v26, %v725_v57 }
 0x1f5   : > { %v727_v40 = vpop.f32.mrf.mxu1 }
 0x1f6   : > { %1074 = vst [vmem:[%s1778_s23 + $0x18] sm:$0xff] %v1043_v32   ;;  %v1038_v29 = vpack.c.bf16 %v744_v56, %v743_v38  ;;  %v754_v27 = vadd.f32 %v1609_v33, %v736_v39  ;;  %v728_v41 = vadd.f32 %v945_v58, %v727_v40 }
 0x1f8   : > { %1073 = vst [vmem:[%s1778_s23 + $0x10] sm:$0xff] %v1038_v29   ;;  %v1063_v21 = vpack.c.bf16 %v754_v27, %v753_v30  ;;  %v752_v61 = vadd.f32 %v1595_v25, %v728_v41 }
 0x1fa   : > { %1078 = vst [vmem:[%s1778_s23 + $0x38] sm:$0xff] %v1063_v21   ;;  %v1058_v33 = vpack.c.bf16 %v752_v61, %v751_v22 }
 0x1fc   : > { %1077 = vst [vmem:[%s1778_s23 + $0x30] sm:$0xff] %v1058_v33  }
 0x1fd   : > { %1311 = shalt.err (!%p1308_p0)
}
 0x1fe   : > { %s1312_s26 = scalar_lea.hbm %s1803_s11, 1024  ;;  %s1316_s6 = scalar_lea.hbm %s1855_s5, 2048 }
 0x1ff   : > { %p1313_p5 = scmp.ne.s32.totalorder %s1803_s11, %s1312_s26  ;;  %p1317_p4 = scmp.lt.s32.totalorder %s1803_s11, %s1855_s5 }
 0x200   : > { %p1318_p6 = scmp.lt.s32.totalorder %s1316_s6, %s1312_s26 }
 0x201   : > { %p1314_p2 = pnand %p1313_p5, %p1873_p11 }
 0x202   : > { %p1319_p8 = por %p1318_p6, %p1317_p4 }
 0x203   : > { %p1315_p1 = pneg %p1314_p2 }
 0x205   : > { %p1320_p3 = pnand %p1319_p8, %p1315_p1 }
 0x207   : > { %1323 = shalt.err (!%p1320_p3)
}
 0x208   : > { %s1373_s27 = smov 64   ;;  %s1374_s28 = smov 4  }
 0x209   : > { %1149 = dma.vmem_to_hbm [thread:$0]  (%p1873_p11), %s1805_s15, 1024, %s1803_s11, %s836_s22, %s1373_s27, %s1373_s27, %s1374_s28  }
 0x20a PF: > { %s864_s12 = sand.u32 1, %s1354_s18   ;;  %p1874_p7 = scmp.ne.s32.totalorder %s1862_s25, 0 }
 0x20b   : > { %p1875_p9 = scmp.ge.s32.totalorder %s1366_s21, 2  ;;  %s865_s9 = scalar_lea.sflag [#allocation4], %s864_s12 }
 0x20d   : > { %p1160_p10 = pnand %p1875_p9, %p1874_p7 }
 0x20f   : > { %p1161_p12 = pneg %p1160_p10 }
 0x211   : > { %1349 = dma.done.wait (%p1161_p12), %s865_s9, 1024  }
 0x212   : > { %1351 = vsyncadd (%p1161_p12), %s865_s9, 4294966272  ;;  %p19_p13 = scmp.ge.s32.totalorder %s1459_s30, 4   ;;  %s1876_s18 = smov %s1358_s19 }
 0x213   : > { %s1877_s19 = smov %s1362_s20  ;;  %s1878_s20 = smov %s1479_s13 }
 0x214   : > { %s1879_s21 = smov %s1459_s30  ;;  %21 = sbr.rel (!%p19_p13) target bundleno = 6 (0x6), region = 89 }
 0x219   :  { %870 = vsyncpa [#allocation3], 1 }
 0x21a   :  { %872 = vsyncpa [#allocation3 + $0x1], 1 }
 0x21b   :  { %873 = vsyncpa [#allocation6], 1 }
 0x21c   :  { %874 = vsyncpa [#allocation4], 1 }
 0x21d   :  { %876 = vsyncpa [#allocation4 + $0x1], 1 }

</bundles_post_ra>
